<compile_context>
chip_gen: v7x
topology: tpu7x:2x2x1
jax: 0.10.0
libtpu: 0.0.40
codegen_flags: <defaults>
</compile_context>

<pallas_src>
import functools

import jax
import jax.numpy as jnp
import numpy as np
from jax.experimental import pallas as pl
from jax.experimental.pallas import tpu as pltpu


# ----------------------------------------------------------------------------
# Fused Pallas kernel: one grid point = one image embedding (+ the text MLP)
# ----------------------------------------------------------------------------
def triplet_kernel(txt_ref, tw1_ref, tb1_ref, tw2_ref, tb2_ref,
                   patches_ref, wconv_ref, bconv_ref, wfc_ref, bfc_ref,
                   out_txt_ref, out_img_ref):
    # txt:     (B, D_text)        bf16
    # tw1:     (D_text, Hid)      bf16   tb1: (1, Hid)  f32
    # tw2:     (Hid, 128)         bf16   tb2: (1, 128)  f32   (E padded to 128 lanes)
    # patches: (1, B*H*W, 9*Cin)  bf16   im2col rows for THIS grid point's image
    # wconv:   (9*Cin, 128)       bf16   Cout padded to 128 lanes (zeros)
    # bconv:   (1, 128)           f32    zeros beyond Cout
    # wfc:     (128, 128)         bf16   rows beyond Cout and cols beyond E are zero
    # bfc:     (1, 128)           f32
    # out_txt: (1, B, 128) f32    out_img: (1, B, 128) f32

    # ---- image branch: single im2col GEMM, lane-dense activations ----
    p = patches_ref[0]                                              # (B*H*W, 9*Cin)
    conv = jnp.dot(p, wconv_ref[...], preferred_element_type=jnp.float32)
    conv = jnp.maximum(conv + bconv_ref[...], 0.0)                  # (B*H*W, 128) f32

    B = out_img_ref.shape[1]
    HW = p.shape[0] // B
    # Global average pool: sublane reduce on dense vregs.
    pooled = conv.reshape(B, HW, conv.shape[-1]).sum(axis=1) * (1.0 / HW)   # (B, 128)

    out_img_ref[0] = jnp.dot(pooled.astype(jnp.bfloat16), wfc_ref[...],
                             preferred_element_type=jnp.float32) + bfc_ref[...]

    # ---- text branch: tiny MLP (recomputed per grid point; per-slot output
    #      keeps writes hazard-free when the parallel grid shards across TCs) ----
    h = jnp.dot(txt_ref[...], tw1_ref[...],
                preferred_element_type=jnp.float32) + tb1_ref[...]
    h = jnp.maximum(h, 0.0)                                         # ReLU (f32)
    out_txt_ref[0] = jnp.dot(h.astype(jnp.bfloat16), tw2_ref[...],
                             preferred_element_type=jnp.float32) + tb2_ref[...]


# ----------------------------------------------------------------------------
# Forward wrapper (jit-fused layout glue + single pallas_call)
# ----------------------------------------------------------------------------
def triplet_net_text2img_forward(params, x1, x2, x3, emb_dim):
    """Matches TripletNetText2Img.forward: (text(x1), image(x2), image(x3))."""
    B, d_text = x1.shape
    _, C, H, W = x2.shape
    HW = H * W
    BHW = B * HW
    hidden = params["t_w1"].shape[1]

    # Layout glue (fused under jit): stack both images, NCHW->NHWC, same-pad,
    # im2col (tap-major: element index = (dy*3+dx)*Cin + c), cast bf16.
    x = jnp.stack([x2, x3], axis=0)                                 # (2, B, C, H, W)
    x = jnp.transpose(x, (0, 1, 3, 4, 2))                           # (2, B, H, W, C)
    xp = jnp.pad(x, ((0, 0), (0, 0), (1, 1), (1, 1), (0, 0)))       # (2, B, Hp, Wp, C)
    patches = jnp.concatenate(
        [xp[:, :, dy:dy + H, dx:dx + W, :] for dy in range(3) for dx in range(3)],
        axis=-1)                                                    # (2, B, H, W, 9C)
    patches = patches.reshape(2, BHW, 9 * C).astype(jnp.bfloat16)

    out_txt, out_img = pl.pallas_call(
        triplet_kernel,
        out_shape=(jax.ShapeDtypeStruct((2, B, 128), jnp.float32),   # text (per slot)
                   jax.ShapeDtypeStruct((2, B, 128), jnp.float32)),  # images
        grid=(2,),
        in_specs=[
            pl.BlockSpec((B, d_text), lambda i: (0, 0)),            # grid-invariant
            pl.BlockSpec((d_text, hidden), lambda i: (0, 0)),
            pl.BlockSpec((1, hidden), lambda i: (0, 0)),
            pl.BlockSpec((hidden, 128), lambda i: (0, 0)),
            pl.BlockSpec((1, 128), lambda i: (0, 0)),
            pl.BlockSpec((1, BHW, 9 * C), lambda i: (i, 0, 0)),     # this image's patches
            pl.BlockSpec((9 * C, 128), lambda i: (0, 0)),
            pl.BlockSpec((1, 128), lambda i: (0, 0)),
            pl.BlockSpec((128, 128), lambda i: (0, 0)),
            pl.BlockSpec((1, 128), lambda i: (0, 0)),
        ],
        out_specs=(pl.BlockSpec((1, B, 128), lambda i: (i, 0, 0)),
                   pl.BlockSpec((1, B, 128), lambda i: (i, 0, 0))),
        compiler_params=pltpu.CompilerParams(
            dimension_semantics=("parallel",)),
    )(x1.astype(jnp.bfloat16), params["t_w1"], params["t_b1"],
      params["t_w2"], params["t_b2"],
      patches, params["i_wconv"], params["i_bconv"],
      params["i_wfc"], params["i_bfc"])

    output1 = out_txt[0, :, :emb_dim]          # both slots hold identical text result
    output2 = out_img[0, :, :emb_dim]
    output3 = out_img[1, :, :emb_dim]
    return output1, output2, output3


# ----------------------------------------------------------------------------
# Deterministic parameter init (synthetic; shapes follow the module structure)
# ----------------------------------------------------------------------------
def init_params(key, d_text, hidden, cin, cout, emb_dim):
    assert emb_dim <= 128 and cout <= 128, "padded to 128 lanes"
    ks = jax.random.split(key, 6)
    s = 0.1
    pad_e = 128 - emb_dim
    pad_c = 128 - cout

    # Text MLP (matmul weights stored bf16; biases f32).
    t_w1 = (s * jax.random.normal(ks[0], (d_text, hidden), jnp.float32)).astype(jnp.bfloat16)
    t_b1 = s * jax.random.normal(ks[1], (1, hidden), jnp.float32)
    t_w2 = s * jax.random.normal(ks[2], (hidden, emb_dim), jnp.float32)
    t_w2 = jnp.pad(t_w2, ((0, 0), (0, pad_e))).astype(jnp.bfloat16)         # lane-dense
    t_b2 = jnp.zeros((1, 128), jnp.float32)

    # Image CNN: PyTorch conv weight (Cout, Cin, 3, 3) -> im2col matrix (9*Cin, Cout),
    # row index = (dy*3+dx)*Cin + c, then Cout zero-padded to 128 lanes.
    wconv_oihw = s * jax.random.normal(ks[3], (cout, cin, 3, 3), jnp.float32)
    i_wconv = jnp.transpose(wconv_oihw, (2, 3, 1, 0)).reshape(9 * cin, cout)
    i_wconv = jnp.pad(i_wconv, ((0, 0), (0, pad_c))).astype(jnp.bfloat16)   # (9*Cin, 128)
    i_bconv = jnp.pad(s * jax.random.normal(ks[4], (1, cout), jnp.float32),
                      ((0, 0), (0, pad_c)))                                 # zeros past Cout
    i_wfc = s * jax.random.normal(ks[5], (cout, emb_dim), jnp.float32)
    i_wfc = jnp.pad(i_wfc, ((0, pad_c), (0, pad_e))).astype(jnp.bfloat16)   # (128, 128)
    i_bfc = jnp.zeros((1, 128), jnp.float32)

    return dict(t_w1=t_w1, t_b1=t_b1, t_w2=t_w2, t_b2=t_b2,
                i_wconv=i_wconv, i_bconv=i_bconv, i_wfc=i_wfc, i_bfc=i_bfc)


# ----------------------------------------------------------------------------
# Plain-JAX f32 reference (uses the same stored weights, upcast to f32)
# ----------------------------------------------------------------------------
def _ref_text(params, x, emb_dim):
    w1 = params["t_w1"].astype(jnp.float32)
    w2 = params["t_w2"][:, :emb_dim].astype(jnp.float32)
    h = jnp.maximum(x @ w1 + params["t_b1"], 0.0)
    return h @ w2 + params["t_b2"][:, :emb_dim]


def _ref_image(params, x_nchw, cout, emb_dim):
    B, C, H, W = x_nchw.shape
    x = jnp.transpose(x_nchw, (0, 2, 3, 1))
    xp = jnp.pad(x, ((0, 0), (1, 1), (1, 1), (0, 0)))
    wconv = params["i_wconv"][:, :cout].astype(jnp.float32).reshape(3, 3, C, cout)
    conv = jnp.zeros((B, H, W, cout), jnp.float32)
    for dy in range(3):
        for dx in range(3):
            conv = conv + xp[:, dy:dy + H, dx:dx + W, :] @ wconv[dy, dx]
    conv = jnp.maximum(conv + params["i_bconv"][:, :cout], 0.0)
    pooled = conv.mean(axis=(1, 2))                                 # (B, Cout)
    wfc = params["i_wfc"][:cout, :emb_dim].astype(jnp.float32)
    return pooled @ wfc + params["i_bfc"][:, :emb_dim]


# ----------------------------------------------------------------------------
if __name__ == "__main__":
    B = 2            # batch
    D_TEXT = 32      # text feature dim
    HIDDEN = 32      # text MLP hidden dim
    CIN, H, W = 4, 16, 16   # image: NCHW = (B, 4, 16, 16)
    COUT = 8         # conv output channels
    EMB = 16         # shared embedding dim

    root = jax.random.PRNGKey(0)
    k_param, k_x1, k_x2, k_x3 = jax.random.split(root, 4)
    params = init_params(k_param, D_TEXT, HIDDEN, CIN, COUT, EMB)

    x1 = jax.random.normal(k_x1, (B, D_TEXT), jnp.float32)        # anchor text
    x2 = jax.random.normal(k_x2, (B, CIN, H, W), jnp.float32)     # positive image (NCHW)
    x3 = jax.random.normal(k_x3, (B, CIN, H, W), jnp.float32)     # negative image (NCHW)

    fwd = jax.jit(triplet_net_text2img_forward, static_argnames=("emb_dim",))
    out1, out2, out3 = jax.block_until_ready(fwd(params, x1, x2, x3, emb_dim=EMB))

    # Sanity check against the plain-JAX reference (bf16 MXU inputs, f32 accum).
    r1 = _ref_text(params, x1, EMB)
    r2 = _ref_image(params, x2, COUT, EMB)
    r3 = _ref_image(params, x3, COUT, EMB)
    assert out1.shape == (B, EMB) and out2.shape == (B, EMB) and out3.shape == (B, EMB)
    np.testing.assert_allclose(np.asarray(out1), np.asarray(r1), rtol=2e-2, atol=2e-2)
    np.testing.assert_allclose(np.asarray(out2), np.asarray(r2), rtol=2e-2, atol=2e-2)
    np.testing.assert_allclose(np.asarray(out3), np.asarray(r3), rtol=2e-2, atol=2e-2)

    print("KERNEL_OK")
</pallas_src>

<mosaic_0001>
module attributes {stable_mosaic.version = 11 : i64} {
  func.func @triplet_kernel(%arg0: i32, %arg1: memref<2x32xbf16, #tpu.memory_space<vmem>>, %arg2: memref<32x32xbf16, #tpu.memory_space<vmem>>, %arg3: memref<1x32xf32, #tpu.memory_space<vmem>>, %arg4: memref<32x128xbf16, #tpu.memory_space<vmem>>, %arg5: memref<1x128xf32, #tpu.memory_space<vmem>>, %arg6: memref<1x512x36xbf16, #tpu.memory_space<vmem>>, %arg7: memref<36x128xbf16, #tpu.memory_space<vmem>>, %arg8: memref<1x128xf32, #tpu.memory_space<vmem>>, %arg9: memref<128x128xbf16, #tpu.memory_space<vmem>>, %arg10: memref<1x128xf32, #tpu.memory_space<vmem>>, %arg11: memref<1x2x128xf32, #tpu.memory_space<vmem>>, %arg12: memref<1x2x128xf32, #tpu.memory_space<vmem>>) attributes {dimension_semantics = [#tpu.dimension_semantics<parallel>], iteration_bounds = array<i64: 2>, scalar_prefetch = 0 : i64, scratch_operands = 0 : i64, tpu.core_type = #tpu.core_type<tc>, window_params = [{pipeline_mode = #tpu.pipeline_mode<synchronous>, transform_indices = @transform_0, window_bounds = array<i64: 2, 32>}, {pipeline_mode = #tpu.pipeline_mode<synchronous>, transform_indices = @transform_1, window_bounds = array<i64: 32, 32>}, {pipeline_mode = #tpu.pipeline_mode<synchronous>, transform_indices = @transform_2, window_bounds = array<i64: 1, 32>}, {pipeline_mode = #tpu.pipeline_mode<synchronous>, transform_indices = @transform_3, window_bounds = array<i64: 32, 128>}, {pipeline_mode = #tpu.pipeline_mode<synchronous>, transform_indices = @transform_4, window_bounds = array<i64: 1, 128>}, {transform_indices = @transform_5, window_bounds = array<i64: 1, 512, 36>}, {pipeline_mode = #tpu.pipeline_mode<synchronous>, transform_indices = @transform_6, window_bounds = array<i64: 36, 128>}, {pipeline_mode = #tpu.pipeline_mode<synchronous>, transform_indices = @transform_7, window_bounds = array<i64: 1, 128>}, {pipeline_mode = #tpu.pipeline_mode<synchronous>, transform_indices = @transform_8, window_bounds = array<i64: 128, 128>}, {pipeline_mode = #tpu.pipeline_mode<synchronous>, transform_indices = @transform_9, window_bounds = array<i64: 1, 128>}, {transform_indices = @transform_10, window_bounds = array<i64: 1, 2, 128>}, {transform_indices = @transform_11, window_bounds = array<i64: 1, 2, 128>}]} {
    %c0 = arith.constant 0 : index
    %c0_0 = arith.constant 0 : index
    %c0_1 = arith.constant 0 : index
    %0 = vector.load %arg6[%c0, %c0_0, %c0_1] : memref<1x512x36xbf16, #tpu.memory_space<vmem>>, vector<1x512x36xbf16>
    %1 = vector.shape_cast %0 : vector<1x512x36xbf16> to vector<512x36xbf16>
    %c0_2 = arith.constant 0 : index
    %c0_3 = arith.constant 0 : index
    %2 = vector.load %arg7[%c0_2, %c0_3] : memref<36x128xbf16, #tpu.memory_space<vmem>>, vector<36x128xbf16>
    %cst = arith.constant dense<0.000000e+00> : vector<512x128xf32>
    %3 = tpu.matmul %1, %2, %cst {dimension_numbers = #tpu.dot_dimension_numbers<[1], [0], [0], [1], [0, 0, 1, 1], [], []>} : vector<512x36xbf16>, vector<36x128xbf16>, vector<512x128xf32> -> vector<512x128xf32>
    %c0_4 = arith.constant 0 : index
    %c0_5 = arith.constant 0 : index
    %4 = vector.load %arg8[%c0_4, %c0_5] : memref<1x128xf32, #tpu.memory_space<vmem>>, vector<1x128xf32>
    %5 = vector.broadcast %4 : vector<1x128xf32> to vector<512x128xf32>
    %6 = arith.addf %3, %5 : vector<512x128xf32>
    %cst_6 = arith.constant 0.000000e+00 : f32
    %7 = vector.broadcast %cst_6 : f32 to vector<512x128xf32>
    %8 = arith.maximumf %6, %7 : vector<512x128xf32>
    %9 = vector.shape_cast %8 : vector<512x128xf32> to vector<2x256x128xf32>
    %cst_7 = arith.constant dense<0.000000e+00> : vector<2x128xf32>
    %10 = vector.multi_reduction <add>, %9, %cst_7 [1] : vector<2x256x128xf32> to vector<2x128xf32>
    %cst_8 = arith.constant 3.906250e-03 : f32
    %11 = vector.broadcast %cst_8 : f32 to vector<2x128xf32>
    %12 = arith.mulf %10, %11 : vector<2x128xf32>
    %13 = arith.truncf %12 : vector<2x128xf32> to vector<2x128xbf16>
    %c0_9 = arith.constant 0 : index
    %c0_10 = arith.constant 0 : index
    %14 = vector.load %arg9[%c0_9, %c0_10] : memref<128x128xbf16, #tpu.memory_space<vmem>>, vector<128x128xbf16>
    %cst_11 = arith.constant dense<0.000000e+00> : vector<2x128xf32>
    %15 = tpu.matmul %13, %14, %cst_11 {dimension_numbers = #tpu.dot_dimension_numbers<[1], [0], [0], [1], [0, 0, 1, 1], [], []>} : vector<2x128xbf16>, vector<128x128xbf16>, vector<2x128xf32> -> vector<2x128xf32>
    %c0_12 = arith.constant 0 : index
    %c0_13 = arith.constant 0 : index
    %16 = vector.load %arg10[%c0_12, %c0_13] : memref<1x128xf32, #tpu.memory_space<vmem>>, vector<1x128xf32>
    %17 = vector.broadcast %16 : vector<1x128xf32> to vector<2x128xf32>
    %18 = arith.addf %15, %17 : vector<2x128xf32>
    %c0_14 = arith.constant 0 : index
    %c0_15 = arith.constant 0 : index
    %c0_16 = arith.constant 0 : index
    %19 = vector.load %arg12[%c0_14, %c0_15, %c0_16] : memref<1x2x128xf32, #tpu.memory_space<vmem>>, vector<1x2x128xf32>
    %20 = vector.shape_cast %19 : vector<1x2x128xf32> to vector<2x128xf32>
    %21 = vector.shape_cast %18 : vector<2x128xf32> to vector<1x2x128xf32>
    tpu.vector_store %arg12[%c0_14, %c0_15, %c0_16], %21 {strides = array<i32>} : memref<1x2x128xf32, #tpu.memory_space<vmem>>, vector<1x2x128xf32>,
    %c0_17 = arith.constant 0 : index
    %c0_18 = arith.constant 0 : index
    %22 = vector.load %arg1[%c0_17, %c0_18] : memref<2x32xbf16, #tpu.memory_space<vmem>>, vector<2x32xbf16>
    %c0_19 = arith.constant 0 : index
    %c0_20 = arith.constant 0 : index
    %23 = vector.load %arg2[%c0_19, %c0_20] : memref<32x32xbf16, #tpu.memory_space<vmem>>, vector<32x32xbf16>
    %cst_21 = arith.constant dense<0.000000e+00> : vector<2x32xf32>
    %24 = tpu.matmul %22, %23, %cst_21 {dimension_numbers = #tpu.dot_dimension_numbers<[1], [0], [0], [1], [0, 0, 1, 1], [], []>} : vector<2x32xbf16>, vector<32x32xbf16>, vector<2x32xf32> -> vector<2x32xf32>
    %c0_22 = arith.constant 0 : index
    %c0_23 = arith.constant 0 : index
    %25 = vector.load %arg3[%c0_22, %c0_23] : memref<1x32xf32, #tpu.memory_space<vmem>>, vector<1x32xf32>
    %26 = vector.broadcast %25 : vector<1x32xf32> to vector<2x32xf32>
    %27 = arith.addf %24, %26 : vector<2x32xf32>
    %cst_24 = arith.constant 0.000000e+00 : f32
    %28 = vector.broadcast %cst_24 : f32 to vector<2x32xf32>
    %29 = arith.maximumf %27, %28 : vector<2x32xf32>
    %30 = arith.truncf %29 : vector<2x32xf32> to vector<2x32xbf16>
    %c0_25 = arith.constant 0 : index
    %c0_26 = arith.constant 0 : index
    %31 = vector.load %arg4[%c0_25, %c0_26] : memref<32x128xbf16, #tpu.memory_space<vmem>>, vector<32x128xbf16>
    %cst_27 = arith.constant dense<0.000000e+00> : vector<2x128xf32>
    %32 = tpu.matmul %30, %31, %cst_27 {dimension_numbers = #tpu.dot_dimension_numbers<[1], [0], [0], [1], [0, 0, 1, 1], [], []>} : vector<2x32xbf16>, vector<32x128xbf16>, vector<2x128xf32> -> vector<2x128xf32>
    %c0_28 = arith.constant 0 : index
    %c0_29 = arith.constant 0 : index
    %33 = vector.load %arg5[%c0_28, %c0_29] : memref<1x128xf32, #tpu.memory_space<vmem>>, vector<1x128xf32>
    %34 = vector.broadcast %33 : vector<1x128xf32> to vector<2x128xf32>
    %35 = arith.addf %32, %34 : vector<2x128xf32>
    %c0_30 = arith.constant 0 : index
    %c0_31 = arith.constant 0 : index
    %c0_32 = arith.constant 0 : index
    %36 = vector.load %arg11[%c0_30, %c0_31, %c0_32] : memref<1x2x128xf32, #tpu.memory_space<vmem>>, vector<1x2x128xf32>
    %37 = vector.shape_cast %36 : vector<1x2x128xf32> to vector<2x128xf32>
    %38 = vector.shape_cast %35 : vector<2x128xf32> to vector<1x2x128xf32>
    tpu.vector_store %arg11[%c0_30, %c0_31, %c0_32], %38 {strides = array<i32>} : memref<1x2x128xf32, #tpu.memory_space<vmem>>, vector<1x2x128xf32>,
    return
  }
  func.func @transform_0(%arg0: i32) -> (i32, i32) {
    %c0_i32 = arith.constant 0 : i32
    %c0_i32_0 = arith.constant 0 : i32
    %c0_i32_1 = arith.constant 0 : i32
    return %c0_i32, %c0_i32_0 : i32, i32
  }
  func.func @transform_1(%arg0: i32) -> (i32, i32) {
    %c0_i32 = arith.constant 0 : i32
    %c0_i32_0 = arith.constant 0 : i32
    %c0_i32_1 = arith.constant 0 : i32
    return %c0_i32, %c0_i32_0 : i32, i32
  }
  func.func @transform_2(%arg0: i32) -> (i32, i32) {
    %c0_i32 = arith.constant 0 : i32
    %c0_i32_0 = arith.constant 0 : i32
    %c0_i32_1 = arith.constant 0 : i32
    return %c0_i32, %c0_i32_0 : i32, i32
  }
  func.func @transform_3(%arg0: i32) -> (i32, i32) {
    %c0_i32 = arith.constant 0 : i32
    %c0_i32_0 = arith.constant 0 : i32
    %c0_i32_1 = arith.constant 0 : i32
    return %c0_i32, %c0_i32_0 : i32, i32
  }
  func.func @transform_4(%arg0: i32) -> (i32, i32) {
    %c0_i32 = arith.constant 0 : i32
    %c0_i32_0 = arith.constant 0 : i32
    %c0_i32_1 = arith.constant 0 : i32
    return %c0_i32, %c0_i32_0 : i32, i32
  }
  func.func @transform_5(%arg0: i32) -> (i32, i32, i32) {
    %c0_i32 = arith.constant 0 : i32
    %c0_i32_0 = arith.constant 0 : i32
    %c0_i32_1 = arith.constant 0 : i32
    return %arg0, %c0_i32, %c0_i32_0 : i32, i32, i32
  }
  func.func @transform_6(%arg0: i32) -> (i32, i32) {
    %c0_i32 = arith.constant 0 : i32
    %c0_i32_0 = arith.constant 0 : i32
    %c0_i32_1 = arith.constant 0 : i32
    return %c0_i32, %c0_i32_0 : i32, i32
  }
  func.func @transform_7(%arg0: i32) -> (i32, i32) {
    %c0_i32 = arith.constant 0 : i32
    %c0_i32_0 = arith.constant 0 : i32
    %c0_i32_1 = arith.constant 0 : i32
    return %c0_i32, %c0_i32_0 : i32, i32
  }
  func.func @transform_8(%arg0: i32) -> (i32, i32) {
    %c0_i32 = arith.constant 0 : i32
    %c0_i32_0 = arith.constant 0 : i32
    %c0_i32_1 = arith.constant 0 : i32
    return %c0_i32, %c0_i32_0 : i32, i32
  }
  func.func @transform_9(%arg0: i32) -> (i32, i32) {
    %c0_i32 = arith.constant 0 : i32
    %c0_i32_0 = arith.constant 0 : i32
    %c0_i32_1 = arith.constant 0 : i32
    return %c0_i32, %c0_i32_0 : i32, i32
  }
  func.func @transform_10(%arg0: i32) -> (i32, i32, i32) {
    %c0_i32 = arith.constant 0 : i32
    %c0_i32_0 = arith.constant 0 : i32
    %c0_i32_1 = arith.constant 0 : i32
    return %arg0, %c0_i32, %c0_i32_0 : i32, i32, i32
  }
  func.func @transform_11(%arg0: i32) -> (i32, i32, i32) {
    %c0_i32 = arith.constant 0 : i32
    %c0_i32_0 = arith.constant 0 : i32
    %c0_i32_1 = arith.constant 0 : i32
    return %arg0, %c0_i32, %c0_i32_0 : i32, i32, i32
  }
}

</mosaic_0001>

<bundles_post_ra>
// kernel: triplet_net_text2img_forward.1
= control target key start
LH: loop header
LB: loop body
LE: loop exit
PB: predicated region body
PF: predicated region fallthrough
CT: control target
= control target key end

     0   :  { %s1909_s17 = smov 0   ;;  %s2221_s0 = inlined_call_operand.vmem [shape: bf16[2,32], index: 0, kind: input, shape index: {}]   ;;  %s2222_s1 = inlined_call_operand.vmem [shape: bf16[32,32], index: 1, kind: input, shape index: {}]   ;;  %s2223_s2 = inlined_call_operand.vmem [shape: f32[1,32], index: 2, kind: input, shape index: {}]   ;;  %s2224_s3 = inlined_call_operand.vmem [shape: bf16[32,128], index: 3, kind: input, shape index: {}]   ;;  %s2225_s4 = inlined_call_operand.vmem [shape: f32[1,128], index: 4, kind: input, shape index: {}]   ;;  %s2226_s5 = inlined_call_operand.vmem [shape: bf16[2,512,36], index: 5, kind: input, shape index: {}]   ;;  %s2227_s6 = inlined_call_operand.vmem [shape: bf16[36,128], index: 6, kind: input, shape index: {}]   ;;  %s2228_s7 = inlined_call_operand.vmem [shape: f32[1,128], index: 7, kind: input, shape index: {}]   ;;  %s2229_s8 = inlined_call_operand.vmem [shape: bf16[128,128], index: 8, kind: input, shape index: {}]   ;;  %s2230_s9 = inlined_call_operand.vmem [shape: f32[1,128], index: 9, kind: input, shape index: {}]   ;;  %s2231_s10 = inlined_call_operand.vmem [shape: f32[2,2,128], index: 10, kind: output, shape index: {0}]   ;;  %s2232_s11 = inlined_call_operand.vmem [shape: f32[2,2,128], index: 11, kind: output, shape index: {1}]  }
   0x1 LB: > { %s1521_s18 = sadd.s32 4294967295, %s1845_s17   ;;  %p1525_p0 = scmp.ge.s32.totalorder %s1845_s17, 1  ;;  %s1845_s17 = sphi %s1909_s17, %s22_s17  }
   0x2   : > { %p340_p1 = scmp.lt.s32.totalorder %s1845_s17, 3 }
   0x4   : > { %p341_p2 = pnand %p1525_p0, %p340_p1 }
   0x5   : > { %v1792_v0 = vld [vmem:[%s2227_s6] sm:$0xff] (!%p341_p2)   ;;  %v1793_v1 = vld [vmem:[%s2227_s6 + $0x8] sm:$0xff] (!%p341_p2)   ;;  %p383_p3 = scmp.lt.s32.totalorder (!%p341_p2), %s1521_s18, 1  ;;  %v1794_v2 = vld [vmem:[%s2227_s6 + $0x10] ss:$0 sps:$4 sm:$0x33] (!%p341_p2)  }
   0x6   : > { %344 = sbr.rel (%p341_p2) target bundleno = 825 (0x339), region = 60  ;;  %1668 = vmatprep.subr.bf16.mxu0 (!%p341_p2), %v1792_v0  ;;  %1774 = vmatprep.subr.bf16.mxu1 (!%p341_p2), %v1792_v0  ;;  %vm745_vm0 = vcmask (!%p341_p2), 1041408   ;;  %vm648_vm1 = vcmask (!%p341_p2), 293888   ;;  %v1827_v36 = vld [vmem:[%s2229_s8] sm:$0xff] (!%p341_p2)   ;;  %v1847_v37 = vmov (!%p341_p2), 0.0   ;;  %v1828_v38 = vld [vmem:[%s2229_s8 + $0x8] sm:$0xff] (!%p341_p2)  }
   0x7   : > { %1669 = vmatpush3.bf16.msra.mxu0 (!%p341_p2), %v1792_v0  ;;  %1777 = vmatpush3.bf16.msra.mxu1 (!%p341_p2), %v1792_v0  ;;  %v747_v4 = vsel (!%p341_p2), %vm745_vm0, %v1794_v2, 0  ;;  %v1829_v39 = vld [vmem:[%s2229_s8 + $0x10] sm:$0xff] (!%p341_p2)   ;;  %v2013_v40 = vld [vmem:[%s2228_s7] ss:$0 sm:$0xff] (!%p341_p2)  ;;  %v1830_v51 = vld [vmem:[%s2229_s8 + $0x18] sm:$0xff] (!%p341_p2)   ;;  %vm1848_vm2 = vmmov (!%p341_p2), 0  }
   0x8   : > { %1670 = vmatprep.subr.bf16.mxu0 (!%p341_p2), %v1793_v1  ;;  %1775 = vmatprep.subr.bf16.mxu1 (!%p341_p2), %v1793_v1  ;;  %v1831_v60 = vld [vmem:[%s2229_s8 + $0x20] sm:$0xff] (!%p341_p2)   ;;  %vm1207_vm3 = vcmask (!%p341_p2), 1041409   ;;  %vm1324_vm4 = vcmask (!%p341_p2), 261120  }
   0xb   : > { %1671 = vmatpush3.bf16.msra.mxu0 (!%p341_p2), %v1793_v1  ;;  %1778 = vmatpush3.bf16.msra.mxu1 (!%p341_p2), %v1793_v1 }
   0xc   : > { %1780 = vmatprep.subr.msk.bf16.mxu0 (!%p341_p2), %vm745_vm0, %v1794_v2  ;;  %1781 = vmatprep.subr.msk.bf16.mxu1 (!%p341_p2), %vm745_vm0, %v1794_v2 }
   0xd   : > { %s2234_s18 = smov (!%p383_p3, %s1521_s18), 1 }
   0xe   : > { %s1617_s25 = sshll.u32 %s2234_s18, 8  ;;  %s1528_s23 = sshll.u32 %s2234_s18, 1 }
   0xf   : > { %s1932_s28 = scalar_lea.vmem %s2226_s5, %s1617_s25  ;;  %1673 = vmatpush3.bf16.msra.mxu0 %v747_v4  ;;  %1779 = vmatpush3.bf16.msra.mxu1 %v747_v4  ;;  %s391_s15 = scalar_lea.vmem %s2231_s10, %s1528_s23 }
  0x10   : > { %v1795_v3 = vld [vmem:[%s1932_s28] sm:$0xff]   ;;  %v1796_v5 = vld [vmem:[%s1932_s28 + $0x8] sm:$0xff]   ;;  %v1797_v6 = vld [vmem:[%s1932_s28 + $0x10] sm:$0xff]   ;;  %1738 = vmatprep.subr.bf16.mxu1 %v1847_v37 }
  0x11   : > { %1674 = vmatprep.mubr.msk.bf16.mxu0 %vm648_vm1, %v1795_v3  ;;  %v1798_v7 = vld [vmem:[%s1932_s28 + $0x18] sm:$0xff]   ;;  %v1799_v8 = vld [vmem:[%s1932_s28 + $0x20] sm:$0xff]   ;;  %v1800_v9 = vld [vmem:[%s1932_s28 + $0x28] sm:$0xff]  }
  0x12   : > { %1675 = vmatmul.mubr.msk.bf16.vlgmr.msra.gmra.mrb[0].mxu0 %vm648_vm1, %v1796_v5  ;;  %v1801_v10 = vld [vmem:[%s1932_s28 + $0x30] sm:$0xff]   ;;  %v1815_v11 = vld [vmem:[%s1932_s28 + $0xa0] sm:$0xff]   ;;  %v1816_v12 = vld [vmem:[%s1932_s28 + $0xa8] sm:$0xff]  }
  0x13   : > { %1678 = vmatprep.mubr.msk.bf16.mxu0 %vm648_vm1, %v1797_v6  ;;  %1714 = vmatprep.mubr.msk.bf16.mxu1 %vm648_vm1, %v1815_v11  ;;  %v1817_v13 = vld [vmem:[%s1932_s28 + $0xb0] sm:$0xff]   ;;  %v1802_v14 = vld [vmem:[%s1932_s28 + $0x38] sm:$0xff]   ;;  %v1803_v15 = vld [vmem:[%s1932_s28 + $0x40] sm:$0xff]  }
  0x14   : > { %1715 = vmatmul.mubr.msk.bf16.vlgmr.msra.gmra.mrb[0].mxu1 %vm648_vm1, %v1816_v12  ;;  %v1818_v16 = vld [vmem:[%s1932_s28 + $0xb8] sm:$0xff]   ;;  %v1819_v17 = vld [vmem:[%s1932_s28 + $0xc0] sm:$0xff]   ;;  %v1804_v18 = vld [vmem:[%s1932_s28 + $0x48] sm:$0xff]  }
  0x15   : > { %1718 = vmatprep.mubr.msk.bf16.mxu1 %vm648_vm1, %v1817_v13  ;;  %v1820_v19 = vld [vmem:[%s1932_s28 + $0xc8] sm:$0xff]   ;;  %v1805_v20 = vld [vmem:[%s1932_s28 + $0x50] sm:$0xff]   ;;  %v1806_v22 = vld [vmem:[%s1932_s28 + $0x58] sm:$0xff]   ;;  %1739 = vmatpush3.bf16.msra.mxu1 %v1827_v36 }
  0x16   : > { %v1821_v21 = vld [vmem:[%s1932_s28 + $0xd0] sm:$0xff]   ;;  %v1822_v23 = vld [vmem:[%s1932_s28 + $0xd8] sm:$0xff]   ;;  %v1807_v24 = vld [vmem:[%s1932_s28 + $0x60] sm:$0xff]   ;;  %1740 = vmatprep.subr.bf16.mxu1 %v1847_v37 }
  0x17   : > { %v1823_v25 = vld [vmem:[%s1932_s28 + $0xe0] sm:$0xff]   ;;  %v1808_v26 = vld [vmem:[%s1932_s28 + $0x68] sm:$0xff]   ;;  %v1809_v28 = vld [vmem:[%s1932_s28 + $0x70] sm:$0xff]  }
  0x18   : > { %v1824_v27 = vld [vmem:[%s1932_s28 + $0xe8] sm:$0xff]   ;;  %v1825_v29 = vld [vmem:[%s1932_s28 + $0xf0] sm:$0xff]   ;;  %v1810_v30 = vld [vmem:[%s1932_s28 + $0x78] sm:$0xff]  }
  0x19   : > { %v1826_v31 = vld [vmem:[%s1932_s28 + $0xf8] sm:$0xff]   ;;  %v1811_v32 = vld [vmem:[%s1932_s28 + $0x80] sm:$0xff]   ;;  %v1812_v33 = vld [vmem:[%s1932_s28 + $0x88] sm:$0xff]   ;;  %1741 = vmatpush3.bf16.msra.mxu1 %v1828_v38 }
  0x1a   : > { %1679 = vmatmul.mubr.msk.bf16.gmra.mrb[4].mxu0 %vm648_vm1, %v1798_v7  ;;  %v1813_v34 = vld [vmem:[%s1932_s28 + $0x90] sm:$0xff]   ;;  %v1814_v35 = vld [vmem:[%s1932_s28 + $0x98] sm:$0xff]   ;;  %1742 = vmatprep.subr.bf16.mxu1 %v1847_v37  ;;  %v1832_v5 = vld [vmem:[%s2229_s8 + $0x28] sm:$0xff]   ;;  %s395_s28 = scalar_lea.vmem %s2232_s11, %s1528_s23 }
  0x1b   : > { %1682 = vmatprep.mubr.msk.bf16.mxu0 %vm648_vm1, %v1799_v8 }
  0x1c   : > { %1719 = vmatmul.mubr.msk.bf16.gmra.mrb[4].mxu1 %vm648_vm1, %v1818_v16 }
  0x1d   : > { %1722 = vmatprep.mubr.msk.bf16.mxu1 %vm648_vm1, %v1819_v17  ;;  %1743 = vmatpush3.bf16.msra.mxu1 %v1829_v39  ;;  %v1833_v17 = vld [vmem:[%s2229_s8 + $0x30] sm:$0xff]  }
  0x1e   : > { %1744 = vmatprep.subr.bf16.mxu1 %v1847_v37 }
  0x21   : > { %1745 = vmatpush3.bf16.msra.mxu1 %v1830_v51 }
  0x22   : > { %1683 = vmatmul.mubr.msk.bf16.gmra.mrb[8].mxu0 %vm648_vm1, %v1800_v9  ;;  %1746 = vmatprep.subr.bf16.mxu1 %v1847_v37 }
  0x23   : > { %1686 = vmatprep.mubr.msk.bf16.mxu0 %vm648_vm1, %v1801_v10 }
  0x24   : > { %1723 = vmatmul.mubr.msk.bf16.gmra.mrb[8].mxu1 %vm648_vm1, %v1820_v19 }
  0x25   : > { %1726 = vmatprep.mubr.msk.bf16.mxu1 %vm648_vm1, %v1821_v21  ;;  %1747 = vmatpush3.bf16.msra.mxu1 %v1831_v60 }
  0x26   : > { %1748 = vmatprep.subr.bf16.mxu1 %v1847_v37 }
  0x29   : > { %1749 = vmatpush3.bf16.msra.mxu1 %v1832_v5 }
  0x2a   : > { %1687 = vmatmul.mubr.msk.bf16.gmra.mrb[12].mxu0 %vm648_vm1, %v1802_v14  ;;  %1750 = vmatprep.subr.bf16.mxu1 %v1847_v37 }
  0x2b   : > { %1690 = vmatprep.mubr.msk.bf16.mxu0 %vm648_vm1, %v1803_v15 }
  0x2c   : > { %1727 = vmatmul.mubr.msk.bf16.gmra.mrb[12].mxu1 %vm648_vm1, %v1822_v23 }
  0x2d   : > { %1730 = vmatprep.mubr.msk.bf16.mxu1 %vm648_vm1, %v1823_v25  ;;  %1751 = vmatpush3.bf16.msra.mxu1 %v1833_v17 }
  0x2e   : > { %1752 = vmatprep.subr.bf16.mxu1 %v1847_v37 }
  0x32   : > { %1691 = vmatmul.mubr.msk.bf16.gmra.mrb[16].mxu0 %vm648_vm1, %v1804_v18 }
  0x33   : > { %1694 = vmatprep.mubr.msk.bf16.mxu0 %vm648_vm1, %v1805_v20 }
  0x34   : > { %1731 = vmatmul.mubr.msk.bf16.gmra.mrb[16].mxu1 %vm648_vm1, %v1824_v27  ;;  %v1834_v27 = vld [vmem:[%s2229_s8 + $0x38] sm:$0xff]  }
  0x35   : > { %1734 = vmatprep.mubr.msk.bf16.mxu1 %vm648_vm1, %v1825_v29  ;;  %1753 = vmatpush3.bf16.msra.mxu1 %v1834_v27 }
  0x36   : > { %1758 = vmatprep.subr.bf16.mxu1 %v1847_v37 }
  0x3a   : > { %1695 = vmatmul.mubr.msk.bf16.gmra.mrb[20].mxu0 %vm648_vm1, %v1806_v22 }
  0x3b   : > { %1698 = vmatprep.mubr.msk.bf16.mxu0 %vm648_vm1, %v1807_v24 }
  0x3c   : > { %1735 = vmatmul.mubr.msk.bf16.gmra.mrb[20].mxu1 %vm648_vm1, %v1826_v31 }
  0x3d   : > { %1754 = vmatprep.mubr.msk.bf16.mxu1 %vm1848_vm2, %v1847_v37 }
  0x42   : > { %1699 = vmatmul.mubr.msk.bf16.gmra.mrb[24].mxu0 %vm648_vm1, %v1808_v26 }
  0x43   : > { %1702 = vmatprep.mubr.msk.bf16.mxu0 %vm648_vm1, %v1809_v28 }
  0x4a   : > { %1703 = vmatmul.mubr.msk.bf16.gmra.mrb[28].mxu0 %vm648_vm1, %v1810_v30 }
  0x4b   : > { %1706 = vmatprep.mubr.msk.bf16.mxu0 %vm648_vm1, %v1811_v32 }
  0x52   : > { %1707 = vmatmul.mubr.msk.bf16.gmra.mrb[32].mxu0 %vm648_vm1, %v1812_v33 }
  0x53   : > { %1710 = vmatprep.mubr.msk.bf16.mxu0 %vm648_vm1, %v1813_v34 }
  0x5a   : > { %1711 = vmatmul.mubr.msk.bf16.gmra.mrb[36].mxu0 %vm648_vm1, %v1814_v35 }
  0xe5   : > { %v1676_v41 = vpop.f32.mrb[0].mxu0 }
  0xe6   : > { %v783_v42 = vpop.f32.mrb[1].mxu0  ;;  %v792_v46 = vadd.f32 %v1676_v41, %v2013_v40 }
  0xe7   : > { %v784_v43 = vadd.f32 %v2013_v40, %v783_v42  ;;  %v1677_v44 = vpop.f32.mrb[2].mxu0  ;;  %v2035_v9 = vpop.f32.mrb[0].mxu1 }
  0xe8   : > { %v786_v45 = vpop.f32.mrb[3].mxu0  ;;  %v795_v49 = vadd.f32 %v1677_v44, %v2013_v40  ;;  %v1040_v52 = vmax.f32 %v792_v46, 0.0  ;;  %v2037_v11 = vpop.f32.mrb[1].mxu1 }
  0xe9   : > { %v787_v47 = vadd.f32 %v2013_v40, %v786_v45  ;;  %v1038_v48 = vmax.f32 %v784_v43, 0.0  ;;  %v2041_v16 = vpop.f32.mrb[2].mxu1 }
  0xea   : > { %v1041_v56 = vmax.f32 %v795_v49, 0.0  ;;  %v2046_v19 = vpop.f32.mrb[3].mxu1 }
  0xeb   : > { %v1039_v50 = vmax.f32 %v787_v47, 0.0 }
  0xed   : > { %v1102_v53 = vadd.f32 %v1039_v50, %v1038_v48  ;;  %v1680_v54 = vpop.f32.mrb[4].mxu0 }
  0xee   : > { %v799_v55 = vpop.f32.mrb[5].mxu0  ;;  %v808_v62 = vadd.f32 %v1680_v54, %v2013_v40 }
  0xef   : > { %v1103_v57 = vadd.f32 %v1102_v53, %v1040_v52  ;;  %v800_v58 = vadd.f32 %v2013_v40, %v799_v55  ;;  %v1681_v59 = vpop.f32.mrb[6].mxu0  ;;  %v2057_v31 = vpop.f32.mrb[4].mxu1 }
  0xf0   : > { %v802_v61 = vpop.f32.mrb[7].mxu0  ;;  %v811_v3 = vadd.f32 %v1681_v59, %v2013_v40  ;;  %v1044_v6 = vmax.f32 %v808_v62, 0.0  ;;  %v2059_v33 = vpop.f32.mrb[5].mxu1 }
  0xf1   : > { %v1042_v63 = vmax.f32 %v800_v58, 0.0  ;;  %v1104_v0 = vadd.f32 %v1103_v57, %v1041_v56  ;;  %v803_v1 = vadd.f32 %v2013_v40, %v802_v61  ;;  %v2063_v39 = vpop.f32.mrb[6].mxu1 }
  0xf2   : > { %v1045_v12 = vmax.f32 %v811_v3, 0.0  ;;  %v2065_v42 = vpop.f32.mrb[7].mxu1 }
  0xf3   : > { %v1105_v2 = vadd.f32 %v1104_v0, %v1042_v63  ;;  %v1043_v4 = vmax.f32 %v803_v1, 0.0 }
  0xf5   : > { %v1106_v7 = vadd.f32 %v1105_v2, %v1043_v4  ;;  %v1684_v8 = vpop.f32.mrb[8].mxu0 }
  0xf6   : > { %v815_v10 = vpop.f32.mrb[9].mxu0  ;;  %v824_v20 = vadd.f32 %v1684_v8, %v2013_v40 }
  0xf7   : > { %v1107_v13 = vadd.f32 %v1106_v7, %v1044_v6  ;;  %v816_v14 = vadd.f32 %v2013_v40, %v815_v10  ;;  %v1685_v15 = vpop.f32.mrb[10].mxu0  ;;  %v2070_v53 = vpop.f32.mrb[8].mxu1 }
  0xf8   : > { %v818_v18 = vpop.f32.mrb[11].mxu0  ;;  %v827_v25 = vadd.f32 %v1685_v15, %v2013_v40  ;;  %v1048_v28 = vmax.f32 %v824_v20, 0.0  ;;  %v2072_v55 = vpop.f32.mrb[9].mxu1 }
  0xf9   : > { %v1046_v21 = vmax.f32 %v816_v14, 0.0  ;;  %v1108_v22 = vadd.f32 %v1107_v13, %v1045_v12  ;;  %v819_v23 = vadd.f32 %v2013_v40, %v818_v18  ;;  %v2075_v60 = vpop.f32.mrb[10].mxu1 }
  0xfa   : > { %v1049_v34 = vmax.f32 %v827_v25, 0.0  ;;  %v2077_v62 = vpop.f32.mrb[11].mxu1 }
  0xfb   : > { %v1109_v24 = vadd.f32 %v1108_v22, %v1046_v21  ;;  %v1047_v26 = vmax.f32 %v819_v23, 0.0 }
  0xfd   : > { %v1110_v29 = vadd.f32 %v1109_v24, %v1047_v26  ;;  %v1688_v30 = vpop.f32.mrb[12].mxu0 }
  0xfe   : > { %v831_v32 = vpop.f32.mrb[13].mxu0  ;;  %v840_v43 = vadd.f32 %v1688_v30, %v2013_v40 }
  0xff   : > { %v1111_v35 = vadd.f32 %v1110_v29, %v1048_v28  ;;  %v832_v36 = vadd.f32 %v2013_v40, %v831_v32  ;;  %v1689_v38 = vpop.f32.mrb[14].mxu0  ;;  %v2082_v10 = vpop.f32.mrb[12].mxu1 }
 0x100   : > { %v834_v41 = vpop.f32.mrb[15].mxu0  ;;  %v843_v48 = vadd.f32 %v1689_v38, %v2013_v40  ;;  %v1052_v50 = vmax.f32 %v840_v43, 0.0  ;;  %v2084_v13 = vpop.f32.mrb[13].mxu1 }
 0x101   : > { %v1050_v44 = vmax.f32 %v832_v36, 0.0  ;;  %v1112_v45 = vadd.f32 %v1111_v35, %v1049_v34  ;;  %v835_v46 = vadd.f32 %v2013_v40, %v834_v41  ;;  %v2087_v20 = vpop.f32.mrb[14].mxu1 }
 0x102   : > { %v1053_v56 = vmax.f32 %v843_v48, 0.0  ;;  %v2089_v22 = vpop.f32.mrb[15].mxu1 }
 0x103   : > { %v1113_v47 = vadd.f32 %v1112_v45, %v1050_v44  ;;  %v1051_v49 = vmax.f32 %v835_v46, 0.0 }
 0x105   : > { %v1114_v51 = vadd.f32 %v1113_v47, %v1051_v49  ;;  %v1692_v52 = vpop.f32.mrb[16].mxu0 }
 0x106   : > { %v847_v54 = vpop.f32.mrb[17].mxu0  ;;  %v856_v63 = vadd.f32 %v1692_v52, %v2013_v40 }
 0x107   : > { %v1115_v57 = vadd.f32 %v1114_v51, %v1052_v50  ;;  %v848_v58 = vadd.f32 %v2013_v40, %v847_v54  ;;  %v1693_v59 = vpop.f32.mrb[18].mxu0  ;;  %v2094_v35 = vpop.f32.mrb[16].mxu1 }
 0x108   : > { %v850_v61 = vpop.f32.mrb[19].mxu0  ;;  %v859_v4 = vadd.f32 %v1693_v59, %v2013_v40  ;;  %v1056_v6 = vmax.f32 %v856_v63, 0.0  ;;  %v2096_v38 = vpop.f32.mrb[17].mxu1 }
 0x109   : > { %v1054_v0 = vmax.f32 %v848_v58, 0.0  ;;  %v1116_v1 = vadd.f32 %v1115_v57, %v1053_v56  ;;  %v851_v2 = vadd.f32 %v2013_v40, %v850_v61  ;;  %v2099_v46 = vpop.f32.mrb[18].mxu1 }
 0x10a   : > { %v1057_v14 = vmax.f32 %v859_v4, 0.0  ;;  %v2101_v48 = vpop.f32.mrb[19].mxu1 }
 0x10b   : > { %v1117_v3 = vadd.f32 %v1116_v1, %v1054_v0  ;;  %v1055_v5 = vmax.f32 %v851_v2, 0.0 }
 0x10d   : > { %v1118_v7 = vadd.f32 %v1117_v3, %v1055_v5  ;;  %v1696_v8 = vpop.f32.mrb[20].mxu0 }
 0x10e   : > { %v863_v12 = vpop.f32.mrb[21].mxu0  ;;  %v872_v23 = vadd.f32 %v1696_v8, %v2013_v40 }
 0x10f   : > { %v1119_v15 = vadd.f32 %v1118_v7, %v1056_v6  ;;  %v864_v17 = vadd.f32 %v2013_v40, %v863_v12  ;;  %v1697_v18 = vpop.f32.mrb[22].mxu0  ;;  %v2106_v63 = vpop.f32.mrb[20].mxu1 }
 0x110   : > { %v866_v21 = vpop.f32.mrb[23].mxu0  ;;  %v875_v28 = vadd.f32 %v1697_v18, %v2013_v40  ;;  %v1060_v30 = vmax.f32 %v872_v23, 0.0  ;;  %v2108_v1 = vpop.f32.mrb[21].mxu1 }
 0x111   : > { %v1058_v24 = vmax.f32 %v864_v17, 0.0  ;;  %v1120_v25 = vadd.f32 %v1119_v15, %v1057_v14  ;;  %v867_v26 = vadd.f32 %v2013_v40, %v866_v21  ;;  %v2111_v6 = vpop.f32.mrb[22].mxu1 }
 0x112   : > { %v1061_v41 = vmax.f32 %v875_v28, 0.0  ;;  %v2113_v8 = vpop.f32.mrb[23].mxu1 }
 0x113   : > { %v1121_v27 = vadd.f32 %v1120_v25, %v1058_v24  ;;  %v1059_v29 = vmax.f32 %v867_v26, 0.0 }
 0x115   : > { %v1122_v32 = vadd.f32 %v1121_v27, %v1059_v29  ;;  %v1700_v34 = vpop.f32.mrb[24].mxu0 }
 0x116   : > { %v879_v36 = vpop.f32.mrb[25].mxu0  ;;  %v888_v49 = vadd.f32 %v1700_v34, %v2013_v40 }
 0x117   : > { %v1123_v43 = vadd.f32 %v1122_v32, %v1060_v30  ;;  %v880_v44 = vadd.f32 %v2013_v40, %v879_v36  ;;  %v1701_v45 = vpop.f32.mrb[26].mxu0 }
 0x118   : > { %v882_v47 = vpop.f32.mrb[27].mxu0  ;;  %v891_v56 = vadd.f32 %v1701_v45, %v2013_v40  ;;  %v1064_v58 = vmax.f32 %v888_v49, 0.0 }
 0x119   : > { %v1062_v50 = vmax.f32 %v880_v44, 0.0  ;;  %v1124_v51 = vadd.f32 %v1123_v43, %v1061_v41  ;;  %v883_v52 = vadd.f32 %v2013_v40, %v882_v47 }
 0x11a   : > { %v1065_v2 = vmax.f32 %v891_v56, 0.0 }
 0x11b   : > { %v1125_v54 = vadd.f32 %v1124_v51, %v1062_v50  ;;  %v1063_v57 = vmax.f32 %v883_v52, 0.0 }
 0x11d   : > { %v1126_v59 = vadd.f32 %v1125_v54, %v1063_v57  ;;  %v1704_v61 = vpop.f32.mrb[28].mxu0 }
 0x11e   : > { %v895_v0 = vpop.f32.mrb[29].mxu0  ;;  %v904_v12 = vadd.f32 %v1704_v61, %v2013_v40 }
 0x11f   : > { %v1127_v3 = vadd.f32 %v1126_v59, %v1064_v58  ;;  %v896_v4 = vadd.f32 %v2013_v40, %v895_v0  ;;  %v1705_v5 = vpop.f32.mrb[30].mxu0 }
 0x120   : > { %v898_v7 = vpop.f32.mrb[31].mxu0  ;;  %v907_v21 = vadd.f32 %v1705_v5, %v2013_v40  ;;  %v1068_v24 = vmax.f32 %v904_v12, 0.0  ;;  %v944_v12 = vadd.f32 %v2013_v40, %v2037_v11  ;;  %v960_v11 = vadd.f32 %v2013_v40, %v2059_v33 }
 0x121   : > { %v1066_v14 = vmax.f32 %v896_v4, 0.0  ;;  %v1128_v15 = vadd.f32 %v1127_v3, %v1065_v2  ;;  %v899_v17 = vadd.f32 %v2013_v40, %v898_v7  ;;  %v976_v33 = vadd.f32 %v2013_v40, %v2072_v55 }
 0x122   : > { %v1069_v28 = vmax.f32 %v907_v21, 0.0  ;;  %v1078_v21 = vmax.f32 %v944_v12, 0.0  ;;  %v992_v55 = vadd.f32 %v2013_v40, %v2084_v13  ;;  %v1008_v13 = vadd.f32 %v2013_v40, %v2096_v38 }
 0x123   : > { %v1129_v18 = vadd.f32 %v1128_v15, %v1066_v14  ;;  %v1067_v23 = vmax.f32 %v899_v17, 0.0  ;;  %v1024_v38 = vadd.f32 %v2013_v40, %v2108_v1 }
 0x125   : > { %v1130_v25 = vadd.f32 %v1129_v18, %v1067_v23  ;;  %v1708_v26 = vpop.f32.mrb[32].mxu0  ;;  %v947_v23 = vadd.f32 %v2013_v40, %v2046_v19  ;;  %v963_v19 = vadd.f32 %v2013_v40, %v2065_v42  ;;  %v979_v42 = vadd.f32 %v2013_v40, %v2077_v62 }
 0x126   : > { %v911_v27 = vpop.f32.mrb[33].mxu0  ;;  %v920_v41 = vadd.f32 %v1708_v26, %v2013_v40  ;;  %v995_v62 = vadd.f32 %v2013_v40, %v2089_v22  ;;  %v1011_v22 = vadd.f32 %v2013_v40, %v2101_v48 }
 0x127   : > { %v1131_v29 = vadd.f32 %v1130_v25, %v1068_v24  ;;  %v912_v30 = vadd.f32 %v2013_v40, %v911_v27  ;;  %v1709_v32 = vpop.f32.mrb[34].mxu0  ;;  %v952_v24 = vadd.f32 %v2035_v9, %v2013_v40  ;;  %v955_v27 = vadd.f32 %v2041_v16, %v2013_v40 }
 0x128   : > { %v914_v34 = vpop.f32.mrb[35].mxu0  ;;  %v923_v45 = vadd.f32 %v1709_v32, %v2013_v40  ;;  %v1072_v49 = vmax.f32 %v920_v41, 0.0  ;;  %v1082_v41 = vmax.f32 %v960_v11, 0.0  ;;  %v968_v9 = vadd.f32 %v2057_v31, %v2013_v40 }
 0x129   : > { %v2119_v36 = vadd.f32 %v1131_v29, %v1069_v28  ;;  %v915_v43 = vadd.f32 %v2013_v40, %v914_v34  ;;  %v1070_v44 = vmax.f32 %v912_v30, 0.0  ;;  %v1079_v28 = vmax.f32 %v947_v23, 0.0 }
 0x12a   : > { %v1073_v54 = vmax.f32 %v923_v45, 0.0  ;;  %v1080_v29 = vmax.f32 %v952_v24, 0.0  ;;  %v1081_v32 = vmax.f32 %v955_v27, 0.0  ;;  %v971_v16 = vadd.f32 %v2063_v39, %v2013_v40 }
 0x12b   : > { %v1071_v47 = vmax.f32 %v915_v43, 0.0  ;;  %v1083_v45 = vmax.f32 %v963_v19, 0.0  ;;  %v984_v31 = vadd.f32 %v2070_v53, %v2013_v40  ;;  %v987_v39 = vadd.f32 %v2075_v60, %v2013_v40 }
 0x12c   : > { %v1000_v53 = vadd.f32 %v2082_v10, %v2013_v40  ;;  %v1003_v60 = vadd.f32 %v2087_v20, %v2013_v40  ;;  %v1016_v10 = vadd.f32 %v2094_v35, %v2013_v40  ;;  %v1133_v20 = vrot.slane %v2119_v36, 4 }
 0x12d   : > { %v1139_v50 = vadd.f32 %v1071_v47, %v1070_v44  ;;  %v1712_v51 = vpop.f32.mrb[36].mxu0  ;;  %v1084_v47 = vmax.f32 %v968_v9, 0.0  ;;  %v1095_v24 = vmax.f32 %v1011_v22, 0.0  ;;  %v1098_v11 = vmax.f32 %v1024_v38, 0.0 }
 0x12e   : > { %v927_v52 = vpop.f32.mrb[37].mxu0  ;;  %v936_v61 = vadd.f32 %v1712_v51, %v2013_v40  ;;  %v1027_v35 = vadd.f32 %v2013_v40, %v2113_v8 }
 0x12f   : > { %v1140_v56 = vadd.f32 %v1139_v50, %v1072_v49  ;;  %v928_v57 = vadd.f32 %v2013_v40, %v927_v52  ;;  %v1713_v58 = vpop.f32.mrb[38].mxu0  ;;  %v1085_v50 = vmax.f32 %v971_v16, 0.0  ;;  %v1086_v52 = vmax.f32 %v976_v33, 0.0 }
 0x130   : > { %v930_v59 = vpop.f32.mrb[39].mxu0  ;;  %v939_v5 = vadd.f32 %v1713_v58, %v2013_v40  ;;  %v1076_v14 = vmax.f32 %v936_v61, 0.0  ;;  %v1088_v58 = vmax.f32 %v984_v31, 0.0  ;;  %v1089_v61 = vmax.f32 %v987_v39, 0.0 }
 0x131   : > { %v1074_v0 = vmax.f32 %v928_v57, 0.0  ;;  %v1141_v2 = vadd.f32 %v1140_v56, %v1073_v54  ;;  %v931_v3 = vadd.f32 %v2013_v40, %v930_v59  ;;  %v1087_v57 = vmax.f32 %v979_v42, 0.0 }
 0x132   : > { %v1077_v17 = vmax.f32 %v939_v5, 0.0  ;;  %v1091_v5 = vmax.f32 %v995_v62, 0.0  ;;  %v1099_v1 = vmax.f32 %v1027_v35, 0.0 }
 0x133   : > { %v1142_v4 = vadd.f32 %v1141_v2, %v1074_v0  ;;  %v1075_v7 = vmax.f32 %v931_v3, 0.0  ;;  %v1090_v2 = vmax.f32 %v992_v55, 0.0  ;;  %v1300_v55 = vld [vmem:[%s2221_s0] sm:$0x1] }
 0x135   : > { %v1143_v15 = vadd.f32 %v1142_v4, %v1075_v7  ;;  %v1092_v7 = vmax.f32 %v1000_v53, 0.0 }
 0x137   : > { %v1144_v18 = vadd.f32 %v1143_v15, %v1076_v14  ;;  %v1093_v14 = vmax.f32 %v1003_v60, 0.0 }
 0x139   : > { %v1145_v25 = vadd.f32 %v1144_v18, %v1077_v17  ;;  %v1094_v17 = vmax.f32 %v1008_v13, 0.0 }
 0x13b   : > { %v1146_v26 = vadd.f32 %v1145_v25, %v1078_v21  ;;  %v1019_v21 = vadd.f32 %v2099_v46, %v2013_v40  ;;  %v1096_v25 = vmax.f32 %v1016_v10, 0.0  ;;  %v1032_v46 = vadd.f32 %v2106_v63, %v2013_v40 }
 0x13d   : > { %v1147_v30 = vadd.f32 %v1146_v26, %v1079_v28  ;;  %v1097_v27 = vmax.f32 %v1019_v21, 0.0  ;;  %v1134_v28 = vadd.f32 %v1133_v20, %v2119_v36 }
 0x13f   : > { %v1148_v34 = vadd.f32 %v1147_v30, %v1080_v29  ;;  %v1135_v30 = vrot.slane %v1134_v28, 2 }
 0x141   : > { %v1149_v43 = vadd.f32 %v1148_v34, %v1081_v32  ;;  %v1035_v34 = vadd.f32 %v2111_v6, %v2013_v40  ;;  %v1136_v9 = vadd.f32 %v1135_v30, %v1134_v28 }
 0x143   : > { %v1150_v44 = vadd.f32 %v1149_v43, %v1082_v41  ;;  %v1100_v41 = vmax.f32 %v1032_v46, 0.0  ;;  %v1101_v43 = vmax.f32 %v1035_v34, 0.0  ;;  %v1137_v16 = vrot.slane %v1136_v9, 1 }
 0x145   : > { %v1151_v49 = vadd.f32 %v1150_v44, %v1083_v45  ;;  %v1138_v8 = vadd.f32 %v1137_v16, %v1136_v9 }
 0x147   : > { %v1152_v51 = vadd.f32 %v1151_v49, %v1084_v47  ;;  %v1176_v63 = vmul.f32 0.00390625, %v1138_v8 }
 0x149   : > { %v1153_v54 = vadd.f32 %v1152_v51, %v1085_v50 }
 0x14b   : > { %v1154_v56 = vadd.f32 %v1153_v54, %v1086_v52  ;;  %v1178_v52 = vpack.c.bf16 %v1176_v63, %v1176_v63 }
 0x14d   : > { %v1155_v59 = vadd.f32 %v1154_v56, %v1087_v57  ;;  %v1205_v40 = vunpack.c.l.b16 %v1178_v52  ;;  %v1835_v56 = vld [vmem:[%s2222_s1] sm:$0xff]   ;;  %v1836_v57 = vld [vmem:[%s2222_s1 + $0x8] sm:$0xff]  }
 0x14f   : > { %v1156_v0 = vadd.f32 %v1155_v59, %v1088_v58  ;;  %v1837_v58 = vld [vmem:[%s2224_s3] sm:$0xff]   ;;  %v1838_v59 = vld [vmem:[%s2224_s3 + $0x8] sm:$0xff]  }
 0x151   : > { %v1157_v3 = vadd.f32 %v1156_v0, %v1089_v61  ;;  %v1598_v61 = vld [vmem:[%s2230_s9] ss:$0 sm:$0xff] }
 0x153   : > { %v1158_v4 = vadd.f32 %v1157_v3, %v1090_v2  ;;  %v1607_v3 = vld [vmem:[%s2223_s2] ss:$0 sm:$0xff] }
 0x155   : > { %v1159_v12 = vadd.f32 %v1158_v4, %v1091_v5 }
 0x157   : > { %v1160_v15 = vadd.f32 %v1159_v12, %v1092_v7 }
 0x159   : > { %v1161_v18 = vadd.f32 %v1160_v15, %v1093_v14  ;;  %v1611_v15 = vld [vmem:[%s2225_s4] ss:$0 sm:$0xff] }
 0x15b   : > { %v1162_v23 = vadd.f32 %v1161_v18, %v1094_v17 }
 0x15d   : > { %v1163_v26 = vadd.f32 %v1162_v23, %v1095_v24 }
 0x15f   : > { %v1164_v48 = vadd.f32 %v1163_v26, %v1096_v25 }
 0x161   : > { %v1165_v29 = vadd.f32 %v1164_v48, %v1097_v27 }
 0x163   : > { %v1166_v32 = vadd.f32 %v1165_v29, %v1098_v11 }
 0x165   : > { %v1167_v19 = vadd.f32 %v1166_v32, %v1099_v1 }
 0x167   : > { %v1168_v36 = vadd.f32 %v1167_v19, %v1100_v41 }
 0x169   : > { %v1169_v44 = vadd.f32 %v1168_v36, %v1101_v43 }
 0x16b   : > { %v1170_v45 = vrot.slane %v1169_v44, 4 }
 0x16d   : > { %v1171_v33 = vadd.f32 %v1170_v45, %v1169_v44 }
 0x16f   : > { %v1172_v47 = vrot.slane %v1171_v33, 2 }
 0x171   : > { %v1173_v49 = vadd.f32 %v1172_v47, %v1171_v33 }
 0x173   : > { %v1174_v50 = vrot.slane %v1173_v49, 1 }
 0x175   : > { %v1175_v51 = vadd.f32 %v1174_v50, %v1173_v49 }
 0x177   : > { %v1177_v42 = vmul.f32 0.00390625, %v1175_v51 }
 0x179   : > { %v1179_v31 = vpack.c.bf16 %v1177_v42, %v1177_v42 }
 0x17b   : > { %v1206_v6 = vunpack.c.l.b16 %v1179_v31 }
 0x17d   : > { %v1208_v54 = vsel %vm1207_vm3, %v1206_v6, %v1205_v40 }
 0x17e   : > { %v1209_v39 = vpack.c.b16 %v1208_v54, %v1208_v54 }
 0x180   : > { %1755 = vmatmul.mubr.bf16.vlgmr.msra.gmra.mrb[24].mxu1 %v1209_v39 }
 0x181   : > { %1759 = vmatpush3.bf16.msra.mxu1 %v1835_v56  ;;  %1762 = vmatprep.mubr.msk.bf16.mxu1 %vm1848_vm2, %v1847_v37 }
 0x182   : > { %1760 = vmatprep.subr.bf16.mxu1 %v1847_v37 }
 0x185   : > { %1761 = vmatpush3.bf16.msra.mxu1 %v1836_v57 }
 0x186   : > { %1766 = vmatprep.subr.bf16.mxu1 %v1847_v37 }
 0x188   : > { %1763 = vmatmul.mubr.msk.bf16.vlgmr.msra.gmra.mrb[28].mxu1 %vm1324_vm4, %v1300_v55 }
 0x189   : > { %1770 = vmatprep.mubr.msk.bf16.mxu1 %vm1848_vm2, %v1847_v37  ;;  %1767 = vmatpush3.bf16.msra.mxu1 %v1837_v58 }
 0x18a   : > { %1768 = vmatprep.subr.bf16.mxu1 %v1847_v37 }
 0x18d   : > { %1769 = vmatpush3.bf16.msra.mxu1 %v1838_v59 }
 0x253   : > { %v1293_v0 = vpop.f32.mrb[24].mxu1 }
 0x254   : > { %v1294_v2 = vadd.f32 %v1598_v61, %v1293_v0  ;;  %v1756_v62 = vpop.f32.mrb[25].mxu1 }
 0x255   : > { %v1296_v53 = vpop.f32.mrb[26].mxu1 }
 0x256   : > { %1299 = vst [vmem:[%s395_s28] sm:$0x3] %v1294_v2  ;;  %v1757_v37 = vpop.f32.mrb[27].mxu1 }
 0x25b   : > { %v1362_v4 = vpop.f32.mrb[28].mxu1 }
 0x25c   : > { %v1363_v60 = vadd.f32 %v1607_v3, %v1362_v4  ;;  %v1764_v5 = vpop.f32.mrb[29].mxu1 }
 0x25d   : > { %v1365_v13 = vpop.f32.mrb[30].mxu1 }
 0x25e   : > { %v1368_v7 = vmax.f32 %v1363_v60, 0.0  ;;  %v1765_v12 = vpop.f32.mrb[31].mxu1 }
 0x260   : > { %v1369_v14 = vpack.c.bf16 %v1368_v7, %v1368_v7 }
 0x262   : > { %1771 = vmatmul.mubr.msk.bf16.vlgmr.msra.gmra.mrb[32].mxu1 %vm1324_vm4, %v1369_v14 }
 0x335   : > { %v1430_v17 = vpop.f32.mrb[32].mxu1 }
 0x336   : > { %v1431_v22 = vadd.f32 %v1611_v15, %v1430_v17  ;;  %v1772_v10 = vpop.f32.mrb[33].mxu1 }
 0x337   : > { %v1433_v18 = vpop.f32.mrb[34].mxu1 }
 0x338   : > { %1436 = vst [vmem:[%s391_s15] sm:$0x3] %v1431_v22  ;;  %v1773_v21 = vpop.f32.mrb[35].mxu1 }
 0x339 PF: > { %s22_s17 = sadd.s32 1, %s1845_s17  }
 0x33a   : > { %p19_p4 = scmp.ge.s32.totalorder %s22_s17, 4  }
 0x33c   :  { %21 = sbr.rel (!%p19_p4) target bundleno = 1 (0x1), region = 102 }

</bundles_post_ra>
